<compile_context>
chip_gen: v6e
topology: v6e:2x2x1
jax: 0.10.0
libtpu: 0.0.40
codegen_flags: <defaults>
</compile_context>

<pallas_src>
import jax
import jax.numpy as jnp
from jax import lax
from jax.experimental import pallas as pl
from jax.experimental.pallas import tpu as pltpu


def henon_heiles_kernel(c_ref, f_ref):
    # c_ref / f_ref: (BLOCK_ROWS, 128) tiles; lanes hold interleaved groups of
    # (x, y, px, py): lane % 4 == 0 -> x, 1 -> y, 2 -> px, 3 -> py.
    c = c_ref[...].astype(jnp.float32)
    lanes = c.shape[1]

    # Cyclic lane rotations (XLU).  Group size 4 divides 128, so every value a
    # real lane actually selects below stays inside its own group; the
    # wrap-around lanes produced by the cyclic roll are never selected.
    nxt = pltpu.roll(c, lanes - 1, axis=1)   # nxt[i] = c[i + 1]  (roll by -1)
    prv = pltpu.roll(c, 1, axis=1)           # prv[i] = c[i - 1]

    lane = lax.broadcasted_iota(jnp.int32, c.shape, 1)
    mod = lane & 3

    # lane%4==0 (x slot):  field_x  =  dH/dy  = y + x^2 - y^2   (x = c,  y = nxt)
    # lane%4==1 (y slot):  field_y  = -dH/dx  = -(x + 2*x*y)    (x = prv, y = c)
    # lane%4==2 (px slot): field_px =  dH/dpy = py               (py = nxt)
    # lane%4==3 (py slot): field_py = -dH/dpx = -px              (px = prv)
    f_x = nxt + c * c - nxt * nxt
    f_y = -(prv + 2.0 * prv * c)
    out = jnp.where(mod == 0, f_x,
          jnp.where(mod == 1, f_y,
          jnp.where(mod == 2, nxt, -prv)))

    f_ref[...] = out.astype(f_ref.dtype)


def _reference(coords):
    """Pure-JAX reference; also the fast path for small batches."""
    x, y, px, py = coords[:, 0], coords[:, 1], coords[:, 2], coords[:, 3]
    dH_x = x + 2.0 * x * y
    dH_y = y + x * x - y * y
    # field = dH @ S.T = (dH_y, -dH_x, py, -px)
    return jnp.stack([dH_y, -dH_x, py, -px], axis=1)


_LANES = 128            # last block dim = one full vreg lane row (unmasked vst)
_MAX_BLOCK_ROWS = 2048  # 2048 * 128 * 4 B = 1 MiB f32 per block per operand


def ode_henon_heiles_forward(t, coords, *, use_pallas=None,
                             max_block_rows=_MAX_BLOCK_ROWS,
                             min_pallas_batch=65536):
    """Pallas equivalent of ODEHenonHeiles.forward(t, coords). `t` is unused."""
    del t
    n, d = coords.shape
    if d != 4:
        raise ValueError("coords must be (batch, 4): (x, y, px, py)")

    if use_pallas is None:
        # Below ~64K elements the fixed pallas_call overhead dominates the
        # ~9 flops/element of work; XLA's fused elementwise path wins there.
        use_pallas = n >= min_pallas_batch
    if not use_pallas:
        return _reference(coords)

    n_elems = n * 4
    rows = -(-n_elems // _LANES)            # ceil(n_elems / 128)
    rows8 = 8 * (-(-rows // 8))             # sublane-align (multiple of 8)
    steps = max(1, -(-rows8 // max_block_rows))
    per_step = -(-rows8 // steps)           # balance rows across grid steps
    block_rows = 8 * (-(-per_step // 8))    # (8,128)-aligned block rows
    rows_pad = block_rows * steps
    pad = rows_pad * _LANES - n_elems

    flat = coords.reshape(-1)               # contiguous reshape: free
    if pad:
        # Only non-(8*128)-aligned batches pay this extra copy / final slice.
        flat = jnp.pad(flat, (0, pad))
    slab = flat.reshape(rows_pad, _LANES)   # free

    out = pl.pallas_call(
        henon_heiles_kernel,
        out_shape=jax.ShapeDtypeStruct((rows_pad, _LANES), coords.dtype),
        grid=(steps,),
        in_specs=[pl.BlockSpec((block_rows, _LANES), lambda i: (i, 0))],
        out_specs=pl.BlockSpec((block_rows, _LANES), lambda i: (i, 0)),
        compiler_params=pltpu.CompilerParams(
            # TODO(synk): on v7x, pltpu.CORE_PARALLEL could shard this
            # streaming grid across both TensorCores; kept "parallel" for
            # portability across v5e/v6e/v7x.
            dimension_semantics=("parallel",),
        ),
    )(slab)

    field = out.reshape(-1)
    if pad:
        field = field[:n_elems]
    return field.reshape(n, 4)


if __name__ == "__main__":
    k1, k2 = jax.random.split(jax.random.PRNGKey(0))
    t = jnp.zeros((), dtype=jnp.float32)

    # 1) Small batch: force the Pallas path so the kernel itself is exercised
    #    (auto-dispatch would route this to the pure-JAX fast path).
    small = jax.random.normal(k1, (8, 4), dtype=jnp.float32)
    out_small = jax.block_until_ready(
        ode_henon_heiles_forward(t, small, use_pallas=True))
    ref_small = _reference(small)
    assert out_small.shape == (8, 4) and out_small.dtype == small.dtype
    assert jnp.allclose(out_small, ref_small, atol=1e-5, rtol=1e-5), (
        f"max abs err = {jnp.max(jnp.abs(out_small - ref_small))}")

    # 2) Larger, unaligned batch: exercises auto-dispatch, the padding path
    #    and a multi-step grid.
    big = jax.random.normal(k2, (70000, 4), dtype=jnp.float32)
    out_big = jax.block_until_ready(ode_henon_heiles_forward(t, big))
    ref_big = _reference(big)
    assert out_big.shape == (70000, 4)
    assert jnp.allclose(out_big, ref_big, atol=1e-5, rtol=1e-5), (
        f"max abs err = {jnp.max(jnp.abs(out_big - ref_big))}")

    print("KERNEL_OK")
</pallas_src>

<mosaic_0001>
module attributes {stable_mosaic.version = 11 : i64} {
  func.func @henon_heiles_kernel(%arg0: i32, %arg1: memref<8x128xf32, #tpu.memory_space<vmem>>, %arg2: memref<8x128xf32, #tpu.memory_space<vmem>>) attributes {dimension_semantics = [#tpu.dimension_semantics<parallel>], iteration_bounds = array<i64: 1>, scalar_prefetch = 0 : i64, scratch_operands = 0 : i64, tpu.core_type = #tpu.core_type<tc>, window_params = [{transform_indices = @transform_0, window_bounds = array<i64: 8, 128>}, {transform_indices = @transform_1, window_bounds = array<i64: 8, 128>}]} {
    %c0 = arith.constant 0 : index
    %c0_0 = arith.constant 0 : index
    %0 = vector.load %arg1[%c0, %c0_0] : memref<8x128xf32, #tpu.memory_space<vmem>>, vector<8x128xf32>
    %c127_i32 = arith.constant 127 : i32
    %1 = tpu.dynamic_rotate %0 by %c127_i32 dim 1 : vector<8x128xf32>, i32 -> vector<8x128xf32>
    %c1_i32 = arith.constant 1 : i32
    %2 = tpu.dynamic_rotate %0 by %c1_i32 dim 1 : vector<8x128xf32>, i32 -> vector<8x128xf32>
    %3 = tpu.iota {dimensions = array<i32: 1>} : vector<8x128xi32>
    %c3_i32 = arith.constant 3 : i32
    %4 = vector.broadcast %c3_i32 : i32 to vector<8x128xi32>
    %5 = arith.andi %3, %4 : vector<8x128xi32>
    %6 = arith.mulf %0, %0 : vector<8x128xf32>
    %7 = arith.addf %1, %6 : vector<8x128xf32>
    %8 = arith.mulf %1, %1 : vector<8x128xf32>
    %9 = arith.subf %7, %8 : vector<8x128xf32>
    %cst = arith.constant 2.000000e+00 : f32
    %10 = vector.broadcast %cst : f32 to vector<8x128xf32>
    %11 = arith.mulf %10, %2 : vector<8x128xf32>
    %12 = arith.mulf %11, %0 : vector<8x128xf32>
    %13 = arith.addf %2, %12 : vector<8x128xf32>
    %cst_1 = arith.constant 0.000000e+00 : f32
    %14 = vector.broadcast %cst_1 : f32 to vector<8x128xf32>
    %15 = arith.subf %14, %13 : vector<8x128xf32>
    %c0_i32 = arith.constant 0 : i32
    %16 = vector.broadcast %c0_i32 : i32 to vector<8x128xi32>
    %17 = arith.cmpi eq, %5, %16 : vector<8x128xi32>
    %c1_i32_2 = arith.constant 1 : i32
    %18 = vector.broadcast %c1_i32_2 : i32 to vector<8x128xi32>
    %19 = arith.cmpi eq, %5, %18 : vector<8x128xi32>
    %c2_i32 = arith.constant 2 : i32
    %20 = vector.broadcast %c2_i32 : i32 to vector<8x128xi32>
    %21 = arith.cmpi eq, %5, %20 : vector<8x128xi32>
    %cst_3 = arith.constant 0.000000e+00 : f32
    %22 = vector.broadcast %cst_3 : f32 to vector<8x128xf32>
    %23 = arith.subf %22, %2 : vector<8x128xf32>
    %24 = arith.select %21, %1, %23 : vector<8x128xi1>, vector<8x128xf32>
    %25 = arith.select %19, %15, %24 : vector<8x128xi1>, vector<8x128xf32>
    %26 = arith.select %17, %9, %25 : vector<8x128xi1>, vector<8x128xf32>
    %c0_4 = arith.constant 0 : index
    %c0_5 = arith.constant 0 : index
    %27 = vector.load %arg2[%c0_4, %c0_5] : memref<8x128xf32, #tpu.memory_space<vmem>>, vector<8x128xf32>
    tpu.vector_store %arg2[%c0_4, %c0_5], %26 {strides = array<i32>} : memref<8x128xf32, #tpu.memory_space<vmem>>, vector<8x128xf32>,
    return
  }
  func.func @transform_0(%arg0: i32) -> (i32, i32) {
    %c0_i32 = arith.constant 0 : i32
    %c0_i32_0 = arith.constant 0 : i32
    return %arg0, %c0_i32 : i32, i32
  }
  func.func @transform_1(%arg0: i32) -> (i32, i32) {
    %c0_i32 = arith.constant 0 : i32
    %c0_i32_0 = arith.constant 0 : i32
    return %arg0, %c0_i32 : i32, i32
  }
}

</mosaic_0001>

<bundles_post_ra>
// kernel: tpu_custom_call.1
= control target key start
LH: loop header
LB: loop body
LE: loop exit
PB: predicated region body
PF: predicated region fallthrough
CT: control target
= control target key end

     0   :  { %6 = vsyncpa [#allocation3], 0  ;;  %s128_s0 = inlined_call_operand.hbm [shape: f32[8,128], index: 0, kind: input, shape index: {}]   ;;  %s129_s1 = inlined_call_operand.hbm [shape: f32[8,128], index: 1, kind: output, shape index: {}]  }
   0x1   :  { %7 = vsyncpa [#allocation4], 0  ;;  %s108_s6 = smov [#allocation2]  }
   0x2   :  { %s14_s7 = sshll.u32 %s108_s6, 4  ;;  %s15_s7 = int_to_ptr.vmem [resolvable:$true] %s14_s7 }
   0x3   :  { %s72_s8 = scalar_lea.vmem %s15_s7, 128  ;;  %p77_p1 = scmp.lt.s32.totalorder %s15_s7, %s15_s7 }
   0x4   :  { %p73_p0 = scmp.ne.s32.totalorder %s15_s7, %s72_s8  ;;  %p78_p2 = scmp.lt.s32.totalorder %s72_s8, %s72_s8 }
   0x6   :  { %p79_p3 = por %p78_p2, %p77_p1 }
   0x8   :  { %p80_p4 = pnand %p79_p3, %p73_p0 }
   0xa   :  { %83 = shalt.err (!%p80_p4)
}
   0xb   :  { %17 = dma.hbm_to_vmem [thread:$0]  %s128_s0, 128, %s15_s7, [#allocation3]  }
   0xc   :  { %104 = dma.done.wait [#allocation3], 128  }
   0xd   :  { %105 = vsyncadd [#allocation3], 4294967168  ;;  %v21_v0 = vld [vmem:[#allocation2] sm:$0xff]  ;;  %s109_s11 = smov 1   ;;  %s110_s12 = smov 127   ;;  %v26_v1 = vlaneseq }
   0xe   :  { %24 = vrot.lane.b32.xlu0 %v21_v0, %s109_s11  ;;  %v29_v6 = vmul.f32 %v21_v0, %v21_v0  ;;  %s111_s0 = smov [#allocation5]  }
   0xf   :  { %v27_v2 = vand.u32 127, %v26_v1  ;;  %s51_s13 = sshll.u32 %s111_s0, 4  ;;  %s52_s13 = int_to_ptr.vmem [resolvable:$true] %s51_s13 }
  0x10   :  { %s84_s14 = scalar_lea.vmem %s52_s13, 128  ;;  %p89_p6 = scmp.lt.s32.totalorder %s52_s13, %s52_s13 }
  0x11   :  { %v28_v5 = vand.u32 3, %v27_v2  ;;  %p85_p5 = scmp.ne.s32.totalorder %s52_s13, %s84_s14  ;;  %p90_p7 = scmp.lt.s32.totalorder %s84_s14, %s84_s14 }
  0x12   :  { %22 = vrot.lane.b32.xlu0 %v21_v0, %s110_s12 }
  0x13   :  { %vm39_vm0 = vcmp.eq.s32.totalorder %v28_v5, 2  ;;  %vm38_vm1 = vcmp.eq.s32.totalorder %v28_v5, 1  ;;  %vm37_vm2 = vcmp.eq.s32.totalorder %v28_v5, 0  ;;  %p91_p8 = por %p90_p7, %p89_p6 }
  0x15   :  { %p92_p9 = pnand %p91_p8, %p85_p5 }
  0x80   :  { %v25_v3 = vpop.permute.xlu0 %24 }
  0x81   :  { %v33_v4 = vmul.f32 2.0, %v25_v3  ;;  %v40_v12 = vsub.f32 0.0, %v25_v3 }
  0x83   :  { %v34_v7 = vmul.f32 %v33_v4, %v21_v0 }
  0x84   :  { %v23_v8 = vpop.permute.xlu0 %22 }
  0x85   :  { %v35_v9 = vadd.f32 %v34_v7, %v25_v3  ;;  %v30_v10 = vadd.f32 %v29_v6, %v23_v8  ;;  %v31_v11 = vmul.f32 %v23_v8, %v23_v8  ;;  %v41_v15 = vsel %vm39_vm0, %v23_v8, %v40_v12 }
  0x87   :  { %v36_v13 = vsub.f32 0.0, %v35_v9  ;;  %v32_v14 = vsub.f32 %v30_v10, %v31_v11 }
  0x89   :  { %v42_v16 = vsel %vm38_vm1, %v36_v13, %v41_v15 }
  0x8a   :  { %v43_v17 = vsel %vm37_vm2, %v32_v14, %v42_v16 }
  0x8b   :  { %44 = vst [vmem:[#allocation5] sm:$0xff] %v43_v17 }
  0x8c   :  { %95 = shalt.err (!%p92_p9)
}
  0x8d   :  { %54 = dma.vmem_to_hbm [thread:$0]  %s52_s13, 128, %s129_s1, [#allocation4]  }
  0x8e   :  { %106 = dma.done.wait [#allocation4], 128  }
  0x8f   :  { %107 = vsyncadd [#allocation4], 4294967168 }
  0x90   :  { %58 = vsyncpa [#allocation3], 1 }
  0x91   :  { %59 = vsyncpa [#allocation4], 1 }

</bundles_post_ra>
